<compile_context>
chip_gen: v7x
topology: tpu7x:2x2x1
jax: 0.10.0
libtpu: 0.0.40
codegen_flags: <defaults>
</compile_context>

<pallas_src>
import functools

import numpy as np
import jax
import jax.numpy as jnp
from jax.experimental import pallas as pl
from jax.experimental.pallas import tpu as pltpu


def _build_selector(m: int, w: int, l_pad: int) -> np.ndarray:
    """0/1 matrix gathering the 4 elements of every 2x2 pooling window.

    Input lane p*2W + t*W + j holds column j of the top (t=0) / bottom (t=1) row
    of packed row-pair p.  Output column c*l_pad + p*(W/2) + q holds window
    element c (0=top-even, 1=top-odd, 2=bot-even, 3=bot-odd) of pooled column q
    of pair p.  Columns beyond l_out inside each l_pad chunk are zero padding.
    """
    half = w // 2
    l_in = 2 * m * w
    l_out = m * half
    sel = np.zeros((l_in, 4 * l_pad), np.float32)
    p = np.repeat(np.arange(m), half)
    q = np.tile(np.arange(half), m)
    o = np.arange(l_out)
    base = p * 2 * w
    in_rows = (base + 2 * q, base + 2 * q + 1, base + w + 2 * q, base + w + 2 * q + 1)
    for c, rows in enumerate(in_rows):
        sel[rows, c * l_pad + o] = 1.0
    return sel


def _smaxpool_kernel(x_ref, s_ref, sel_ref, snew_ref, out_ref, *, l_out: int, l_pad: int):
    """One row tile: lanes pack m row-pairs, each [row 2i | row 2i+1] of width W."""
    x = x_ref[...].astype(jnp.float32)          # (rt, 2mW)
    s = s_ref[...].astype(jnp.float32)

    u = s + x                                   # updated sumspike
    snew_ref[...] = u.astype(snew_ref.dtype)

    sel = sel_ref[...]                          # (2mW, 4*l_pad) 0/1 selector, bf16
    # One MXU gather per tensor.  bf16 operands are exact for 0/1 spikes and for
    # accumulated counts <= 256 timesteps; f32 accumulate keeps the sums exact.
    gx = jnp.dot(x.astype(jnp.bfloat16), sel, preferred_element_type=jnp.float32)
    gu = jnp.dot(u.astype(jnp.bfloat16), sel, preferred_element_type=jnp.float32)

    gb = gx + 1000.0 * gu                       # window elements of x + 1000*sumspike

    def window_max(g):                          # max over four 128-aligned chunks
        res = jnp.maximum(g[:, 0 * l_pad:1 * l_pad], g[:, 1 * l_pad:2 * l_pad])
        res = jnp.maximum(res, g[:, 2 * l_pad:3 * l_pad])
        return jnp.maximum(res, g[:, 3 * l_pad:4 * l_pad])

    pool_u = window_max(gu)                     # maxpool2x2(sumspike)
    pool_b = window_max(gb)                     # maxpool2x2(x + 1000*sumspike)
    res = pool_b - 1000.0 * pool_u              # x1000 factored out of the sumspike pool
    if l_pad != l_out:
        res = res[:, :l_out]
    out_ref[...] = res.astype(out_ref.dtype)


def smaxpool_forward(x, sumspike, *, target_block_bytes: int = 1 << 20):
    """Functional SMaxPool forward with a MaxPool2d(2, 2) child op.

    Returns (out, new_sumspike); out has shape (N, C, H//2, W//2).
    """
    assert x.shape == sumspike.shape and x.ndim == 4
    n, c, h, w = x.shape
    assert h % 2 == 0 and w % 2 == 0, "MaxPool2d(2,2) needs even H, W"
    # TODO(synk): only the standard MaxPool2d(kernel_size=2, stride=2) child op is
    # implemented; arbitrary `child` pooling ops need generalized selection matrices.

    # Pack m row-pairs per lane row: lane-dense pooled output (target >=128 lanes)
    # while keeping the matmul K dim (2mW) <= 512 so the MXU stays under HBM time.
    total_pairs = n * c * (h // 2)
    m = 1
    while total_pairs % (2 * m) == 0 and 2 * m * w <= 256:
        m *= 2
    r = total_pairs // m
    lanes = 2 * m * w                           # input lane width per row
    half = w // 2
    l_out = m * half                            # pooled lane width per row
    l_pad = ((l_out + 127) // 128) * 128        # 128-aligned selector chunk width

    x2 = x.reshape(r, lanes)                    # free reshapes: m row-pairs per row
    s2 = sumspike.reshape(r, lanes)
    sel = jnp.asarray(_build_selector(m, w, l_pad), jnp.bfloat16)

    # Adaptive row tile: ~target_block_bytes per input block, 8-row aligned.
    itemsize = jnp.dtype(x.dtype).itemsize
    rt = max(8, target_block_bytes // (lanes * itemsize))
    rt = min(rt, r)
    if r >= 8:
        rt -= rt % 8
    if r >= 16 and rt >= r:                     # >=2 grid steps: keep both v7x TCs busy
        rt = max(8, (r // 2) // 8 * 8)
    grid = (pl.cdiv(r, rt),)

    kernel = functools.partial(_smaxpool_kernel, l_out=l_out, l_pad=l_pad)
    snew2, out2 = pl.pallas_call(
        kernel,
        out_shape=(
            jax.ShapeDtypeStruct((r, lanes), x.dtype),    # updated sumspike
            jax.ShapeDtypeStruct((r, l_out), x.dtype),    # pooled difference
        ),
        grid=grid,
        in_specs=[
            pl.BlockSpec((rt, lanes), lambda i: (i, 0)),
            pl.BlockSpec((rt, lanes), lambda i: (i, 0)),
            # Constant block index -> the selector is DMA'd once and stays resident.
            pl.BlockSpec((sel.shape[0], sel.shape[1]), lambda i: (0, 0)),
        ],
        out_specs=(
            pl.BlockSpec((rt, lanes), lambda i: (i, 0)),
            pl.BlockSpec((rt, l_out), lambda i: (i, 0)),
        ),
        compiler_params=pltpu.CompilerParams(
            dimension_semantics=("parallel",),
            vmem_limit_bytes=32 * 1024 * 1024,
        ),
    )(x2, s2, sel)

    out = out2.reshape(n, c, h // 2, w // 2)
    new_sumspike = snew2.reshape(n, c, h, w)
    return out, new_sumspike


# ---------------------------------------------------------------------------
# Pure-JAX reference mirroring the PyTorch module.
# ---------------------------------------------------------------------------
def _maxpool2x2_ref(t):
    n, c, h, w = t.shape
    return t.reshape(n, c, h // 2, 2, w // 2, 2).max(axis=(3, 5))


def smaxpool_reference(x, sumspike):
    s_new = sumspike + x
    a = s_new * 1000.0
    return _maxpool2x2_ref(x + a) - _maxpool2x2_ref(a), s_new


if __name__ == "__main__":
    key = jax.random.PRNGKey(0)
    k1, k2 = jax.random.split(key)

    N, C, H, W = 2, 4, 16, 16
    # Binary spike trains, as this layer sees during ANN->SNN conversion.
    x1 = jax.random.bernoulli(k1, 0.3, (N, C, H, W)).astype(jnp.float32)
    x2 = jax.random.bernoulli(k2, 0.3, (N, C, H, W)).astype(jnp.float32)
    s0 = jnp.zeros((N, C, H, W), jnp.float32)

    fwd = jax.jit(smaxpool_forward)

    # Two timesteps to exercise the stateful spike accumulation.
    out1, s1 = fwd(x1, s0)
    out2, s2 = fwd(x2, s1)
    jax.block_until_ready((out1, s1, out2, s2))

    ref1, rs1 = smaxpool_reference(x1, s0)
    ref2, rs2 = smaxpool_reference(x2, rs1)

    assert out1.shape == (N, C, H // 2, W // 2) and out1.dtype == x1.dtype
    assert jnp.allclose(s1, rs1) and jnp.allclose(s2, rs2)
    assert jnp.allclose(out1, ref1, atol=1e-3, rtol=1e-3)
    assert jnp.allclose(out2, ref2, atol=1e-3, rtol=1e-3)

    print("KERNEL_OK")
</pallas_src>

<mosaic_0001>
module attributes {stable_mosaic.version = 11 : i64} {
  func.func @_smaxpool_kernel(%arg0: i32, %arg1: memref<4x512xf32, #tpu.memory_space<vmem>>, %arg2: memref<4x512xf32, #tpu.memory_space<vmem>>, %arg3: memref<512x512xbf16, #tpu.memory_space<vmem>>, %arg4: memref<4x512xf32, #tpu.memory_space<vmem>>, %arg5: memref<4x128xf32, #tpu.memory_space<vmem>>) attributes {dimension_semantics = [#tpu.dimension_semantics<parallel>], iteration_bounds = array<i64: 1>, scalar_prefetch = 0 : i64, scratch_operands = 0 : i64, tpu.core_type = #tpu.core_type<tc>, window_params = [{transform_indices = @transform_0, window_bounds = array<i64: 4, 512>}, {transform_indices = @transform_1, window_bounds = array<i64: 4, 512>}, {pipeline_mode = #tpu.pipeline_mode<synchronous>, transform_indices = @transform_2, window_bounds = array<i64: 512, 512>}, {transform_indices = @transform_3, window_bounds = array<i64: 4, 512>}, {transform_indices = @transform_4, window_bounds = array<i64: 4, 128>}]} {
    %c0 = arith.constant 0 : index
    %c0_0 = arith.constant 0 : index
    %0 = vector.load %arg1[%c0, %c0_0] : memref<4x512xf32, #tpu.memory_space<vmem>>, vector<4x512xf32>
    %c0_1 = arith.constant 0 : index
    %c0_2 = arith.constant 0 : index
    %1 = vector.load %arg2[%c0_1, %c0_2] : memref<4x512xf32, #tpu.memory_space<vmem>>, vector<4x512xf32>
    %2 = arith.addf %1, %0 : vector<4x512xf32>
    %c0_3 = arith.constant 0 : index
    %c0_4 = arith.constant 0 : index
    %3 = vector.load %arg4[%c0_3, %c0_4] : memref<4x512xf32, #tpu.memory_space<vmem>>, vector<4x512xf32>
    tpu.vector_store %arg4[%c0_3, %c0_4], %2 {strides = array<i32>} : memref<4x512xf32, #tpu.memory_space<vmem>>, vector<4x512xf32>,
    %c0_5 = arith.constant 0 : index
    %c0_6 = arith.constant 0 : index
    %4 = vector.load %arg3[%c0_5, %c0_6] : memref<512x512xbf16, #tpu.memory_space<vmem>>, vector<512x512xbf16>
    %5 = arith.truncf %0 : vector<4x512xf32> to vector<4x512xbf16>
    %cst = arith.constant dense<0.000000e+00> : vector<4x512xf32>
    %6 = tpu.matmul %5, %4, %cst {dimension_numbers = #tpu.dot_dimension_numbers<[1], [0], [0], [1], [0, 0, 1, 1], [], []>} : vector<4x512xbf16>, vector<512x512xbf16>, vector<4x512xf32> -> vector<4x512xf32>
    %7 = arith.truncf %2 : vector<4x512xf32> to vector<4x512xbf16>
    %cst_7 = arith.constant dense<0.000000e+00> : vector<4x512xf32>
    %8 = tpu.matmul %7, %4, %cst_7 {dimension_numbers = #tpu.dot_dimension_numbers<[1], [0], [0], [1], [0, 0, 1, 1], [], []>} : vector<4x512xbf16>, vector<512x512xbf16>, vector<4x512xf32> -> vector<4x512xf32>
    %cst_8 = arith.constant 1.000000e+03 : f32
    %9 = vector.broadcast %cst_8 : f32 to vector<4x512xf32>
    %10 = arith.mulf %9, %8 : vector<4x512xf32>
    %11 = arith.addf %6, %10 : vector<4x512xf32>
    %12 = vector.extract_strided_slice %8 {offsets = [0, 0], sizes = [4, 128], strides = [1, 1]} : vector<4x512xf32> to vector<4x128xf32>
    %13 = vector.extract_strided_slice %8 {offsets = [0, 128], sizes = [4, 128], strides = [1, 1]} : vector<4x512xf32> to vector<4x128xf32>
    %14 = arith.maximumf %12, %13 : vector<4x128xf32>
    %15 = vector.extract_strided_slice %8 {offsets = [0, 256], sizes = [4, 128], strides = [1, 1]} : vector<4x512xf32> to vector<4x128xf32>
    %16 = arith.maximumf %14, %15 : vector<4x128xf32>
    %17 = vector.extract_strided_slice %8 {offsets = [0, 384], sizes = [4, 128], strides = [1, 1]} : vector<4x512xf32> to vector<4x128xf32>
    %18 = arith.maximumf %16, %17 : vector<4x128xf32>
    %19 = vector.extract_strided_slice %11 {offsets = [0, 0], sizes = [4, 128], strides = [1, 1]} : vector<4x512xf32> to vector<4x128xf32>
    %20 = vector.extract_strided_slice %11 {offsets = [0, 128], sizes = [4, 128], strides = [1, 1]} : vector<4x512xf32> to vector<4x128xf32>
    %21 = arith.maximumf %19, %20 : vector<4x128xf32>
    %22 = vector.extract_strided_slice %11 {offsets = [0, 256], sizes = [4, 128], strides = [1, 1]} : vector<4x512xf32> to vector<4x128xf32>
    %23 = arith.maximumf %21, %22 : vector<4x128xf32>
    %24 = vector.extract_strided_slice %11 {offsets = [0, 384], sizes = [4, 128], strides = [1, 1]} : vector<4x512xf32> to vector<4x128xf32>
    %25 = arith.maximumf %23, %24 : vector<4x128xf32>
    %cst_9 = arith.constant 1.000000e+03 : f32
    %26 = vector.broadcast %cst_9 : f32 to vector<4x128xf32>
    %27 = arith.mulf %26, %18 : vector<4x128xf32>
    %28 = arith.subf %25, %27 : vector<4x128xf32>
    %c0_10 = arith.constant 0 : index
    %c0_11 = arith.constant 0 : index
    %29 = vector.load %arg5[%c0_10, %c0_11] : memref<4x128xf32, #tpu.memory_space<vmem>>, vector<4x128xf32>
    tpu.vector_store %arg5[%c0_10, %c0_11], %28 {strides = array<i32>} : memref<4x128xf32, #tpu.memory_space<vmem>>, vector<4x128xf32>,
    return
  }
  func.func @transform_0(%arg0: i32) -> (i32, i32) {
    %c0_i32 = arith.constant 0 : i32
    %c0_i32_0 = arith.constant 0 : i32
    return %arg0, %c0_i32 : i32, i32
  }
  func.func @transform_1(%arg0: i32) -> (i32, i32) {
    %c0_i32 = arith.constant 0 : i32
    %c0_i32_0 = arith.constant 0 : i32
    return %arg0, %c0_i32 : i32, i32
  }
  func.func @transform_2(%arg0: i32) -> (i32, i32) {
    %c0_i32 = arith.constant 0 : i32
    %c0_i32_0 = arith.constant 0 : i32
    %c0_i32_1 = arith.constant 0 : i32
    return %c0_i32, %c0_i32_0 : i32, i32
  }
  func.func @transform_3(%arg0: i32) -> (i32, i32) {
    %c0_i32 = arith.constant 0 : i32
    %c0_i32_0 = arith.constant 0 : i32
    return %arg0, %c0_i32 : i32, i32
  }
  func.func @transform_4(%arg0: i32) -> (i32, i32) {
    %c0_i32 = arith.constant 0 : i32
    %c0_i32_0 = arith.constant 0 : i32
    return %arg0, %c0_i32 : i32, i32
  }
}

</mosaic_0001>

<bundles_post_ra>
// kernel: smaxpool_forward.1
= control target key start
LH: loop header
LB: loop body
LE: loop exit
PB: predicated region body
PF: predicated region fallthrough
CT: control target
= control target key end

     0   :  { %s2466_s2 = inlined_call_operand.vmem [shape: bf16[512,512], index: 2, kind: input, shape index: {}]   ;;  %s2467_s0 = inlined_call_operand.vmem [shape: f32[4,512], index: 0, kind: input, shape index: {}]   ;;  %s2468_s1 = inlined_call_operand.vmem [shape: f32[4,512], index: 1, kind: input, shape index: {}]   ;;  %s2469_s3 = inlined_call_operand.vmem [shape: f32[4,512], index: 3, kind: output, shape index: {0}]   ;;  %s2470_s4 = inlined_call_operand.vmem [shape: f32[4,128], index: 4, kind: output, shape index: {1}]  }
   0x1   :  { %v1531_v0 = vld [vmem:[%s2466_s2 + $0x4] ss:$16 sps:$4 sm:$0xff]   ;;  %v1536_v1 = vld [vmem:[%s2466_s2 + $0xc] ss:$16 sps:$4 sm:$0xff]   ;;  %v1542_v2 = vld [vmem:[%s2466_s2] ss:$16 sps:$4 sm:$0xff]  }
   0x2   :  { %812 = vmatprep.subr.bf16.mxu0 %v1531_v0  ;;  %v1547_v3 = vld [vmem:[%s2466_s2 + $0x8] ss:$16 sps:$4 sm:$0xff]   ;;  %894 = vmatprep.subr.bf16.mxu1 %v1536_v1  ;;  %v1553_v4 = vld [vmem:[%s2466_s2 + $0x24] ss:$16 sps:$4 sm:$0xff]   ;;  %v1560_v5 = vld [vmem:[%s2466_s2 + $0x2c] ss:$16 sps:$4 sm:$0xff]  }
   0x3   :  { %813 = vmatpush1.bf16.msra.mxu0 %v1542_v2  ;;  %895 = vmatpush1.bf16.msra.mxu1 %v1547_v3  ;;  %v1565_v6 = vld [vmem:[%s2466_s2 + $0x20] ss:$16 sps:$4 sm:$0xff]   ;;  %v1571_v7 = vld [vmem:[%s2466_s2 + $0x28] ss:$16 sps:$4 sm:$0xff]   ;;  %v1577_v8 = vld [vmem:[%s2466_s2 + $0x44] ss:$16 sps:$4 sm:$0xff]  }
   0x4   :  { %814 = vmatprep.subr.bf16.mxu0 %v1553_v4  ;;  %896 = vmatprep.subr.bf16.mxu1 %v1560_v5  ;;  %v1582_v9 = vld [vmem:[%s2466_s2 + $0x4c] ss:$16 sps:$4 sm:$0xff]   ;;  %v1587_v10 = vld [vmem:[%s2466_s2 + $0x40] ss:$16 sps:$4 sm:$0xff]   ;;  %v1592_v11 = vld [vmem:[%s2466_s2 + $0x48] ss:$16 sps:$4 sm:$0xff]  }
   0x5   :  { %v1599_v12 = vld [vmem:[%s2466_s2 + $0x64] ss:$16 sps:$4 sm:$0xff]   ;;  %v1606_v13 = vld [vmem:[%s2466_s2 + $0x6c] ss:$16 sps:$4 sm:$0xff]   ;;  %v1611_v14 = vld [vmem:[%s2466_s2 + $0x60] ss:$16 sps:$4 sm:$0xff]  }
   0x6   :  { %v1618_v15 = vld [vmem:[%s2466_s2 + $0x68] ss:$16 sps:$4 sm:$0xff]   ;;  %v1623_v16 = vld [vmem:[%s2466_s2 + $0x84] ss:$16 sps:$4 sm:$0xff]   ;;  %v1630_v17 = vld [vmem:[%s2466_s2 + $0x8c] ss:$16 sps:$4 sm:$0xff]  }
   0x7   :  { %815 = vmatpush1.bf16.msra.mxu0 %v1565_v6  ;;  %897 = vmatpush1.bf16.msra.mxu1 %v1571_v7  ;;  %v1635_v18 = vld [vmem:[%s2466_s2 + $0x80] ss:$16 sps:$4 sm:$0xff]   ;;  %v1640_v19 = vld [vmem:[%s2466_s2 + $0x88] ss:$16 sps:$4 sm:$0xff]   ;;  %v1647_v20 = vld [vmem:[%s2466_s2 + $0xa4] ss:$16 sps:$4 sm:$0xff]  }
   0x8   :  { %816 = vmatprep.subr.bf16.mxu0 %v1577_v8  ;;  %898 = vmatprep.subr.bf16.mxu1 %v1582_v9  ;;  %v1654_v21 = vld [vmem:[%s2466_s2 + $0xac] ss:$16 sps:$4 sm:$0xff]   ;;  %v1659_v22 = vld [vmem:[%s2466_s2 + $0xa0] ss:$16 sps:$4 sm:$0xff]   ;;  %v1666_v23 = vld [vmem:[%s2466_s2 + $0xa8] ss:$16 sps:$4 sm:$0xff]  }
   0x9   :  { %v1671_v24 = vld [vmem:[%s2466_s2 + $0xc4] ss:$16 sps:$4 sm:$0xff]   ;;  %v1678_v25 = vld [vmem:[%s2466_s2 + $0xcc] ss:$16 sps:$4 sm:$0xff]   ;;  %v1683_v26 = vld [vmem:[%s2466_s2 + $0xc0] ss:$16 sps:$4 sm:$0xff]  }
   0xa   :  { %v1688_v27 = vld [vmem:[%s2466_s2 + $0xc8] ss:$16 sps:$4 sm:$0xff]   ;;  %v1695_v28 = vld [vmem:[%s2466_s2 + $0xe4] ss:$16 sps:$4 sm:$0xff]   ;;  %v1702_v29 = vld [vmem:[%s2466_s2 + $0xec] ss:$16 sps:$4 sm:$0xff]  }
   0xb   :  { %817 = vmatpush1.bf16.msra.mxu0 %v1587_v10  ;;  %899 = vmatpush1.bf16.msra.mxu1 %v1592_v11  ;;  %v1707_v30 = vld [vmem:[%s2466_s2 + $0xe0] ss:$16 sps:$4 sm:$0xff]   ;;  %v1714_v31 = vld [vmem:[%s2466_s2 + $0xe8] ss:$16 sps:$4 sm:$0xff]   ;;  %v1719_v32 = vld [vmem:[%s2466_s2 + $0x104] ss:$16 sps:$4 sm:$0xff]  }
   0xc   :  { %818 = vmatprep.subr.bf16.mxu0 %v1599_v12  ;;  %900 = vmatprep.subr.bf16.mxu1 %v1606_v13  ;;  %v1726_v33 = vld [vmem:[%s2466_s2 + $0x10c] ss:$16 sps:$4 sm:$0xff]   ;;  %v1731_v34 = vld [vmem:[%s2466_s2 + $0x100] ss:$16 sps:$4 sm:$0xff]   ;;  %v1736_v35 = vld [vmem:[%s2466_s2 + $0x108] ss:$16 sps:$4 sm:$0xff]  }
   0xd   :  { %v1743_v36 = vld [vmem:[%s2466_s2 + $0x124] ss:$16 sps:$4 sm:$0xff]   ;;  %v1750_v37 = vld [vmem:[%s2466_s2 + $0x12c] ss:$16 sps:$4 sm:$0xff]   ;;  %v1755_v38 = vld [vmem:[%s2466_s2 + $0x120] ss:$16 sps:$4 sm:$0xff]  }
   0xe   :  { %v1762_v39 = vld [vmem:[%s2466_s2 + $0x128] ss:$16 sps:$4 sm:$0xff]   ;;  %v1767_v40 = vld [vmem:[%s2466_s2 + $0x144] ss:$16 sps:$4 sm:$0xff]   ;;  %v1774_v41 = vld [vmem:[%s2466_s2 + $0x14c] ss:$16 sps:$4 sm:$0xff]  }
   0xf   :  { %819 = vmatpush1.bf16.msra.mxu0 %v1611_v14  ;;  %901 = vmatpush1.bf16.msra.mxu1 %v1618_v15  ;;  %v1779_v42 = vld [vmem:[%s2466_s2 + $0x140] ss:$16 sps:$4 sm:$0xff]   ;;  %v1784_v43 = vld [vmem:[%s2466_s2 + $0x148] ss:$16 sps:$4 sm:$0xff]   ;;  %v1791_v44 = vld [vmem:[%s2466_s2 + $0x164] ss:$16 sps:$4 sm:$0xff]  }
  0x10   :  { %820 = vmatprep.subr.bf16.mxu0 %v1623_v16  ;;  %902 = vmatprep.subr.bf16.mxu1 %v1630_v17  ;;  %v1798_v45 = vld [vmem:[%s2466_s2 + $0x16c] ss:$16 sps:$4 sm:$0xff]   ;;  %v1803_v46 = vld [vmem:[%s2466_s2 + $0x160] ss:$16 sps:$4 sm:$0xff]   ;;  %v1808_v47 = vld [vmem:[%s2466_s2 + $0x168] ss:$16 sps:$4 sm:$0xff]  }
  0x11   :  { %v1813_v48 = vld [vmem:[%s2467_s0] sm:$0xff]  ;;  %v1818_v49 = vld [vmem:[%s2467_s0 + $0x8] sm:$0xff] }
  0x12   :  { %2542 = vst [vmem:[#allocation2_spill] sm:$0xff] %v1818_v49  ;;  %v18_v50 = vld [vmem:[%s2468_s1] sm:$0xff]  ;;  %v19_v51 = vld [vmem:[%s2468_s1 + $0x8] sm:$0xff] }
  0x13   :  { %821 = vmatpush1.bf16.msra.mxu0 %v1635_v18  ;;  %903 = vmatpush1.bf16.msra.mxu1 %v1640_v19  ;;  %v1831_v52 = vld [vmem:[%s2466_s2 + $0x184] ss:$16 sps:$4 sm:$0xff]   ;;  %v20_v53 = vadd.f32 %v18_v50, %v1813_v48  ;;  %v1835_v54 = vadd.f32 %v19_v51, %v1818_v49  ;;  %v1842_v55 = vld [vmem:[%s2466_s2 + $0x18c] ss:$16 sps:$4 sm:$0xff]   ;;  %v1854_v57 = vld [vmem:[%s2466_s2 + $0x180] ss:$16 sps:$4 sm:$0xff]  }
  0x14   :  { %822 = vmatprep.subr.bf16.mxu0 %v1647_v20  ;;  %904 = vmatprep.subr.bf16.mxu1 %v1654_v21  ;;  %2543 = vst [vmem:[#allocation3_spill] sm:$0xff] %v1854_v57  ;;  %v1859_v58 = vld [vmem:[%s2466_s2 + $0x188] ss:$16 sps:$4 sm:$0xff]   ;;  %v1866_v59 = vld [vmem:[%s2466_s2 + $0x1a4] ss:$16 sps:$4 sm:$0xff]  }
  0x15   :  { %22 = vst [vmem:[%s2469_s3] sm:$0xff] %v20_v53  ;;  %v164_v56 = vcombine.high %v20_v53, %v20_v53  ;;  %23 = vst [vmem:[%s2469_s3 + $0x8] sm:$0xff] %v1835_v54  ;;  %v1873_v61 = vld [vmem:[%s2466_s2 + $0x1ac] ss:$16 sps:$4 sm:$0xff]   ;;  %v1878_v62 = vld [vmem:[%s2466_s2 + $0x1a0] ss:$16 sps:$4 sm:$0xff]  }
  0x16   :  { %2544 = vst [vmem:[#allocation4_spill] sm:$0xff] %v1859_v58  ;;  %2545 = vst [vmem:[#allocation5_spill] sm:$0xff] %v1866_v59  ;;  %v1883_v63 = vld [vmem:[%s2466_s2 + $0x1a8] ss:$16 sps:$4 sm:$0xff]   ;;  %v1890_v50 = vld [vmem:[%s2466_s2 + $0x1c4] ss:$16 sps:$4 sm:$0xff]  }
  0x17   :  { %823 = vmatpush1.bf16.msra.mxu0 %v1659_v22  ;;  %905 = vmatpush1.bf16.msra.mxu1 %v1666_v23  ;;  %v169_v60 = vpack.c.bf16 %v164_v56, %v164_v56  ;;  %2546 = vst [vmem:[#allocation6_spill] sm:$0xff] %v1873_v61  ;;  %2547 = vst [vmem:[#allocation7_spill] sm:$0xff] %v1878_v62  ;;  %v1897_v51 = vld [vmem:[%s2466_s2 + $0x1cc] ss:$16 sps:$4 sm:$0xff]   ;;  %v1902_v56 = vld [vmem:[%s2466_s2 + $0x1c0] ss:$16 sps:$4 sm:$0xff]  }
  0x18   :  { %824 = vmatprep.subr.bf16.mxu0 %v1671_v24  ;;  %906 = vmatprep.subr.bf16.mxu1 %v1678_v25  ;;  %2548 = vst [vmem:[#allocation8_spill] sm:$0xff] %v1883_v63  ;;  %2549 = vst [vmem:[#allocation9_spill] sm:$0xff] %v1890_v50  ;;  %v1914_v49 = vld [vmem:[%s2466_s2 + $0x1e4] ss:$16 sps:$4 sm:$0xff]  }
  0x19   :  { %844 = vmatprep.mubr.bf16.mxu0 %v169_v60  ;;  %926 = vmatprep.mubr.bf16.mxu1 %v169_v60  ;;  %2550 = vst [vmem:[#allocation10_spill] sm:$0xff] %v1897_v51  ;;  %2551 = vst [vmem:[#allocation11_spill] sm:$0xff] %v1902_v56  ;;  %v1907_v60 = vld [vmem:[%s2466_s2 + $0x1c8] ss:$16 sps:$4 sm:$0xff]  }
  0x1a   :  { %2552 = vst [vmem:[#allocation12_spill] sm:$0xff] %v1907_v60  ;;  %2553 = vst [vmem:[#allocation13_spill] sm:$0xff] %v1914_v49 }
  0x1b   :  { %825 = vmatpush1.bf16.msra.mxu0 %v1683_v26  ;;  %907 = vmatpush1.bf16.msra.mxu1 %v1688_v27 }
  0x1c   :  { %826 = vmatprep.subr.bf16.mxu0 %v1695_v28  ;;  %908 = vmatprep.subr.bf16.mxu1 %v1702_v29 }
  0x1f   :  { %827 = vmatpush1.bf16.msra.mxu0 %v1707_v30  ;;  %909 = vmatpush1.bf16.msra.mxu1 %v1714_v31 }
  0x20   :  { %828 = vmatprep.subr.bf16.mxu0 %v1719_v32  ;;  %910 = vmatprep.subr.bf16.mxu1 %v1726_v33 }
  0x23   :  { %829 = vmatpush1.bf16.msra.mxu0 %v1731_v34  ;;  %911 = vmatpush1.bf16.msra.mxu1 %v1736_v35 }
  0x24   :  { %830 = vmatprep.subr.bf16.mxu0 %v1743_v36  ;;  %912 = vmatprep.subr.bf16.mxu1 %v1750_v37 }
  0x27   :  { %831 = vmatpush1.bf16.msra.mxu0 %v1755_v38  ;;  %913 = vmatpush1.bf16.msra.mxu1 %v1762_v39 }
  0x28   :  { %832 = vmatprep.subr.bf16.mxu0 %v1767_v40  ;;  %914 = vmatprep.subr.bf16.mxu1 %v1774_v41 }
  0x2b   :  { %833 = vmatpush1.bf16.msra.mxu0 %v1779_v42  ;;  %915 = vmatpush1.bf16.msra.mxu1 %v1784_v43 }
  0x2c   :  { %834 = vmatprep.subr.bf16.mxu0 %v1791_v44  ;;  %916 = vmatprep.subr.bf16.mxu1 %v1798_v45 }
  0x2f   :  { %835 = vmatpush1.bf16.msra.mxu0 %v1803_v46  ;;  %917 = vmatpush1.bf16.msra.mxu1 %v1808_v47 }
  0x30   :  { %836 = vmatprep.subr.bf16.mxu0 %v1831_v52  ;;  %918 = vmatprep.subr.bf16.mxu1 %v1842_v55 }
  0x33   :  { %837 = vmatpush1.bf16.msra.mxu0 %v1854_v57  ;;  %919 = vmatpush1.bf16.msra.mxu1 %v1859_v58  ;;  %v1971_v58 = vld [vmem:[%s2466_s2 + $0x22c] ss:$16 sps:$4 sm:$0xff]  }
  0x34   :  { %838 = vmatprep.subr.bf16.mxu0 %v1866_v59  ;;  %920 = vmatprep.subr.bf16.mxu1 %v1873_v61  ;;  %v1921_v61 = vld [vmem:[%s2466_s2 + $0x1ec] ss:$16 sps:$4 sm:$0xff]   ;;  %v165_v59 = vcombine.high %v1835_v54, %v1835_v54  ;;  %2558 = vst [vmem:[#allocation18_spill] sm:$0xff] %v1971_v58 }
  0x35   :  { %2554 = vst [vmem:[#allocation14_spill] sm:$0xff] %v1921_v61 }
  0x36   :  { %v171_v57 = vpack.c.bf16 %v165_v59, %v165_v59  ;;  %v1988_v59 = vld [vmem:[%s2466_s2 + $0x244] ss:$16 sps:$4 sm:$0xff]  }
  0x37   :  { %839 = vmatpush1.bf16.msra.mxu0 %v1878_v62  ;;  %921 = vmatpush1.bf16.msra.mxu1 %v1883_v63  ;;  %v1926_v62 = vld [vmem:[%s2466_s2 + $0x1e0] ss:$16 sps:$4 sm:$0xff]   ;;  %v1931_v63 = vld [vmem:[%s2466_s2 + $0x1e8] ss:$16 sps:$4 sm:$0xff]   ;;  %2561 = vst [vmem:[#allocation21_spill] sm:$0xff] %v1988_v59 }
  0x38   :  { %840 = vmatprep.subr.bf16.mxu0 %v1890_v50  ;;  %922 = vmatprep.subr.bf16.mxu1 %v1897_v51  ;;  %2555 = vst [vmem:[#allocation15_spill] sm:$0xff] %v1931_v63  ;;  %v1938_v51 = vld [vmem:[%s2466_s2 + $0x204] ss:$16 sps:$4 sm:$0xff]   ;;  %v1945_v50 = vld [vmem:[%s2466_s2 + $0x20c] ss:$16 sps:$4 sm:$0xff]  }
  0x3b   :  { %841 = vmatpush1.bf16.msra.mxu0 %v1902_v56  ;;  %923 = vmatpush1.bf16.msra.mxu1 %v1907_v60  ;;  %v1952_v60 = vld [vmem:[%s2466_s2 + $0x200] ss:$16 sps:$4 sm:$0xff]   ;;  %v1957_v56 = vld [vmem:[%s2466_s2 + $0x208] ss:$16 sps:$4 sm:$0xff]  }
  0x3c   :  { %842 = vmatprep.subr.bf16.mxu0 %v1914_v49  ;;  %924 = vmatprep.subr.bf16.mxu1 %v1921_v61  ;;  %2556 = vst [vmem:[#allocation16_spill] sm:$0xff] %v1952_v60  ;;  %2557 = vst [vmem:[#allocation17_spill] sm:$0xff] %v1957_v56  ;;  %v168_v49 = vpack.c.bf16 %v20_v53, %v20_v53  ;;  %v1964_v61 = vld [vmem:[%s2466_s2 + $0x224] ss:$16 sps:$4 sm:$0xff]   ;;  %v1976_v53 = vld [vmem:[%s2466_s2 + $0x220] ss:$16 sps:$4 sm:$0xff]  }
  0x3d   :  { %2559 = vst [vmem:[#allocation19_spill] sm:$0xff] %v1976_v53 }
  0x3f   :  { %843 = vmatpush1.bf16.msra.mxu0 %v1926_v62  ;;  %925 = vmatpush1.bf16.msra.mxu1 %v1931_v63  ;;  %v1981_v63 = vld [vmem:[%s2466_s2 + $0x228] ss:$16 sps:$4 sm:$0xff]  }
  0x40   :  { %853 = vmatprep.subr.bf16.mxu0 %v1938_v51  ;;  %935 = vmatprep.subr.bf16.mxu1 %v1945_v50  ;;  %2560 = vst [vmem:[#allocation20_spill] sm:$0xff] %v1981_v63 }
  0x42   :  { %845 = vmatmul.mubr.bf16.vlgmr.msra.gmra.mrb[0].mxu0 %v168_v49  ;;  %927 = vmatmul.mubr.bf16.vlgmr.msra.gmra.mrb[0].mxu1 %v168_v49  ;;  %v1995_v49 = vld [vmem:[%s2466_s2 + $0x24c] ss:$16 sps:$4 sm:$0xff]  }
  0x43   :  { %854 = vmatpush1.bf16.msra.mxu0 %v1952_v60  ;;  %936 = vmatpush1.bf16.msra.mxu1 %v1957_v56  ;;  %2562 = vst [vmem:[#allocation22_spill] sm:$0xff] %v1995_v49  ;;  %v2000_v56 = vld [vmem:[%s2466_s2 + $0x240] ss:$16 sps:$4 sm:$0xff]   ;;  %v2005_v60 = vld [vmem:[%s2466_s2 + $0x248] ss:$16 sps:$4 sm:$0xff]  }
  0x44   :  { %855 = vmatprep.subr.bf16.mxu0 %v1964_v61  ;;  %937 = vmatprep.subr.bf16.mxu1 %v1971_v58  ;;  %2563 = vst [vmem:[#allocation23_spill] sm:$0xff] %v2000_v56  ;;  %2564 = vst [vmem:[#allocation24_spill] sm:$0xff] %v2005_v60  ;;  %v2012_v58 = vld [vmem:[%s2466_s2 + $0x264] ss:$16 sps:$4 sm:$0xff]  }
  0x45   :  { %885 = vmatprep.mubr.bf16.mxu0 %v171_v57  ;;  %967 = vmatprep.mubr.bf16.mxu1 %v171_v57  ;;  %2565 = vst [vmem:[#allocation25_spill] sm:$0xff] %v2012_v58  ;;  %v2019_v57 = vld [vmem:[%s2466_s2 + $0x26c] ss:$16 sps:$4 sm:$0xff]  }
  0x46   :  { %2566 = vst [vmem:[#allocation26_spill] sm:$0xff] %v2019_v57 }
  0x47   :  { %856 = vmatpush1.bf16.msra.mxu0 %v1976_v53  ;;  %938 = vmatpush1.bf16.msra.mxu1 %v1981_v63  ;;  %v2024_v53 = vld [vmem:[%s2466_s2 + $0x260] ss:$16 sps:$4 sm:$0xff]   ;;  %v2029_v63 = vld [vmem:[%s2466_s2 + $0x268] ss:$16 sps:$4 sm:$0xff]  }
  0x48   :  { %857 = vmatprep.subr.bf16.mxu0 %v1988_v59  ;;  %939 = vmatprep.subr.bf16.mxu1 %v1995_v49  ;;  %2567 = vst [vmem:[#allocation27_spill] sm:$0xff] %v2024_v53  ;;  %2568 = vst [vmem:[#allocation28_spill] sm:$0xff] %v2029_v63  ;;  %v2036_v49 = vld [vmem:[%s2466_s2 + $0x284] ss:$16 sps:$4 sm:$0xff]   ;;  %v2043_v59 = vld [vmem:[%s2466_s2 + $0x28c] ss:$16 sps:$4 sm:$0xff]  }
  0x49   :  { %2569 = vst [vmem:[#allocation29_spill] sm:$0xff] %v2036_v49  ;;  %2570 = vst [vmem:[#allocation30_spill] sm:$0xff] %v2043_v59 }
  0x4b   :  { %858 = vmatpush1.bf16.msra.mxu0 %v2000_v56  ;;  %940 = vmatpush1.bf16.msra.mxu1 %v2005_v60  ;;  %v2048_v56 = vld [vmem:[%s2466_s2 + $0x280] ss:$16 sps:$4 sm:$0xff]   ;;  %v2053_v60 = vld [vmem:[%s2466_s2 + $0x288] ss:$16 sps:$4 sm:$0xff]  }
  0x4c   :  { %859 = vmatprep.subr.bf16.mxu0 %v2012_v58  ;;  %941 = vmatprep.subr.bf16.mxu1 %v2019_v57  ;;  %2571 = vst [vmem:[#allocation31_spill] sm:$0xff] %v2053_v60  ;;  %v2060_v57 = vld [vmem:[%s2466_s2 + $0x2a4] ss:$16 sps:$4 sm:$0xff]   ;;  %v2067_v58 = vld [vmem:[%s2466_s2 + $0x2ac] ss:$16 sps:$4 sm:$0xff]  }
  0x4d   :  { %2572 = vst [vmem:[#allocation32_spill] sm:$0xff] %v2060_v57  ;;  %2573 = vst [vmem:[#allocation33_spill] sm:$0xff] %v2067_v58 }
  0x4f   :  { %860 = vmatpush1.bf16.msra.mxu0 %v2024_v53  ;;  %942 = vmatpush1.bf16.msra.mxu1 %v2029_v63  ;;  %v2072_v53 = vld [vmem:[%s2466_s2 + $0x2a0] ss:$16 sps:$4 sm:$0xff]   ;;  %v2077_v63 = vld [vmem:[%s2466_s2 + $0x2a8] ss:$16 sps:$4 sm:$0xff]  }
  0x50   :  { %861 = vmatprep.subr.bf16.mxu0 %v2036_v49  ;;  %943 = vmatprep.subr.bf16.mxu1 %v2043_v59  ;;  %2574 = vst [vmem:[#allocation34_spill] sm:$0xff] %v2072_v53  ;;  %2575 = vst [vmem:[#allocation35_spill] sm:$0xff] %v2077_v63  ;;  %v2084_v59 = vld [vmem:[%s2466_s2 + $0x2c4] ss:$16 sps:$4 sm:$0xff]   ;;  %v2091_v49 = vld [vmem:[%s2466_s2 + $0x2cc] ss:$16 sps:$4 sm:$0xff]  }
  0x51   :  { %2576 = vst [vmem:[#allocation36_spill] sm:$0xff] %v2084_v59  ;;  %2577 = vst [vmem:[#allocation37_spill] sm:$0xff] %v2091_v49 }
  0x53   :  { %862 = vmatpush1.bf16.msra.mxu0 %v2048_v56  ;;  %944 = vmatpush1.bf16.msra.mxu1 %v2053_v60  ;;  %v2098_v60 = vld [vmem:[%s2466_s2 + $0x2c0] ss:$16 sps:$4 sm:$0xff]  }
  0x54   :  { %863 = vmatprep.subr.bf16.mxu0 %v2060_v57  ;;  %945 = vmatprep.subr.bf16.mxu1 %v2067_v58  ;;  %2578 = vst [vmem:[#allocation38_spill] sm:$0xff] %v2098_v60  ;;  %v2103_v57 = vld [vmem:[%s2466_s2 + $0x2c8] ss:$16 sps:$4 sm:$0xff]   ;;  %v154_v58 = vcombine.high %v1813_v48, %v1813_v48 }
  0x55   :  { %2579 = vst [vmem:[#allocation39_spill] sm:$0xff] %v2103_v57 }
  0x57   :  { %864 = vmatpush1.bf16.msra.mxu0 %v2072_v53  ;;  %946 = vmatpush1.bf16.msra.mxu1 %v2077_v63  ;;  %v2110_v53 = vld [vmem:[%s2466_s2 + $0x2e4] ss:$16 sps:$4 sm:$0xff]   ;;  %v2115_v63 = vld [vmem:[%s2466_s2 + $0x2ec] ss:$16 sps:$4 sm:$0xff]  }
  0x58   :  { %865 = vmatprep.subr.bf16.mxu0 %v2084_v59  ;;  %947 = vmatprep.subr.bf16.mxu1 %v2091_v49  ;;  %2580 = vst [vmem:[#allocation40_spill] sm:$0xff] %v2110_v53  ;;  %2581 = vst [vmem:[#allocation41_spill] sm:$0xff] %v2115_v63  ;;  %v2122_v59 = vld [vmem:[%s2466_s2 + $0x2e0] ss:$16 sps:$4 sm:$0xff]   ;;  %v2127_v49 = vld [vmem:[%s2466_s2 + $0x2e8] ss:$16 sps:$4 sm:$0xff]  }
  0x59   :  { %2582 = vst [vmem:[#allocation42_spill] sm:$0xff] %v2122_v59  ;;  %2583 = vst [vmem:[#allocation43_spill] sm:$0xff] %v2127_v49 }
  0x5b   :  { %866 = vmatpush1.bf16.msra.mxu0 %v2098_v60  ;;  %948 = vmatpush1.bf16.msra.mxu1 %v2103_v57  ;;  %v2134_v60 = vld [vmem:[%s2466_s2 + $0x304] ss:$16 sps:$4 sm:$0xff]   ;;  %v2139_v57 = vld [vmem:[%s2466_s2 + $0x30c] ss:$16 sps:$4 sm:$0xff]  }
  0x5c   :  { %867 = vmatprep.subr.bf16.mxu0 %v2110_v53  ;;  %949 = vmatprep.subr.bf16.mxu1 %v2115_v63  ;;  %2584 = vst [vmem:[#allocation44_spill] sm:$0xff] %v2134_v60  ;;  %2585 = vst [vmem:[#allocation45_spill] sm:$0xff] %v2139_v57  ;;  %v2146_v53 = vld [vmem:[%s2466_s2 + $0x300] ss:$16 sps:$4 sm:$0xff]   ;;  %v2151_v63 = vld [vmem:[%s2466_s2 + $0x308] ss:$16 sps:$4 sm:$0xff]  }
  0x5d   :  { %2586 = vst [vmem:[#allocation46_spill] sm:$0xff] %v2146_v53  ;;  %2587 = vst [vmem:[#allocation47_spill] sm:$0xff] %v2151_v63 }
  0x5f   :  { %868 = vmatpush1.bf16.msra.mxu0 %v2122_v59  ;;  %950 = vmatpush1.bf16.msra.mxu1 %v2127_v49  ;;  %v2158_v59 = vld [vmem:[%s2466_s2 + $0x324] ss:$16 sps:$4 sm:$0xff]   ;;  %v2163_v49 = vld [vmem:[%s2466_s2 + $0x32c] ss:$16 sps:$4 sm:$0xff]  }
  0x60   :  { %869 = vmatprep.subr.bf16.mxu0 %v2134_v60  ;;  %951 = vmatprep.subr.bf16.mxu1 %v2139_v57  ;;  %2588 = vst [vmem:[#allocation48_spill] sm:$0xff] %v2158_v59  ;;  %2589 = vst [vmem:[#allocation49_spill] sm:$0xff] %v2163_v49  ;;  %v2170_v60 = vld [vmem:[%s2466_s2 + $0x320] ss:$16 sps:$4 sm:$0xff]   ;;  %v2175_v57 = vld [vmem:[%s2466_s2 + $0x328] ss:$16 sps:$4 sm:$0xff]  }
  0x61   :  { %2590 = vst [vmem:[#allocation50_spill] sm:$0xff] %v2170_v60  ;;  %2591 = vst [vmem:[#allocation51_spill] sm:$0xff] %v2175_v57 }
  0x63   :  { %870 = vmatpush1.bf16.msra.mxu0 %v2146_v53  ;;  %952 = vmatpush1.bf16.msra.mxu1 %v2151_v63  ;;  %v2182_v53 = vld [vmem:[%s2466_s2 + $0x344] ss:$16 sps:$4 sm:$0xff]   ;;  %v2187_v63 = vld [vmem:[%s2466_s2 + $0x34c] ss:$16 sps:$4 sm:$0xff]  }
  0x64   :  { %871 = vmatprep.subr.bf16.mxu0 %v2158_v59  ;;  %953 = vmatprep.subr.bf16.mxu1 %v2163_v49  ;;  %2592 = vst [vmem:[#allocation52_spill] sm:$0xff] %v2182_v53  ;;  %2593 = vst [vmem:[#allocation53_spill] sm:$0xff] %v2187_v63  ;;  %v2194_v59 = vld [vmem:[%s2466_s2 + $0x340] ss:$16 sps:$4 sm:$0xff]   ;;  %v2199_v49 = vld [vmem:[%s2466_s2 + $0x348] ss:$16 sps:$4 sm:$0xff]  }
  0x65   :  { %2594 = vst [vmem:[#allocation54_spill] sm:$0xff] %v2194_v59  ;;  %2595 = vst [vmem:[#allocation55_spill] sm:$0xff] %v2199_v49 }
  0x67   :  { %872 = vmatpush1.bf16.msra.mxu0 %v2170_v60  ;;  %954 = vmatpush1.bf16.msra.mxu1 %v2175_v57  ;;  %v2206_v60 = vld [vmem:[%s2466_s2 + $0x364] ss:$16 sps:$4 sm:$0xff]   ;;  %v2211_v57 = vld [vmem:[%s2466_s2 + $0x36c] ss:$16 sps:$4 sm:$0xff]  }
  0x68   :  { %873 = vmatprep.subr.bf16.mxu0 %v2182_v53  ;;  %955 = vmatprep.subr.bf16.mxu1 %v2187_v63  ;;  %2596 = vst [vmem:[#allocation56_spill] sm:$0xff] %v2206_v60  ;;  %2597 = vst [vmem:[#allocation57_spill] sm:$0xff] %v2211_v57  ;;  %v2218_v53 = vld [vmem:[%s2466_s2 + $0x360] ss:$16 sps:$4 sm:$0xff]   ;;  %v2223_v63 = vld [vmem:[%s2466_s2 + $0x368] ss:$16 sps:$4 sm:$0xff]  }
  0x69   :  { %2598 = vst [vmem:[#allocation58_spill] sm:$0xff] %v2218_v53  ;;  %2599 = vst [vmem:[#allocation59_spill] sm:$0xff] %v2223_v63 }
  0x6b   :  { %874 = vmatpush1.bf16.msra.mxu0 %v2194_v59  ;;  %956 = vmatpush1.bf16.msra.mxu1 %v2199_v49  ;;  %v2230_v59 = vld [vmem:[%s2466_s2 + $0x384] ss:$16 sps:$4 sm:$0xff]   ;;  %v2235_v49 = vld [vmem:[%s2466_s2 + $0x38c] ss:$16 sps:$4 sm:$0xff]  }
  0x6c   :  { %875 = vmatprep.subr.bf16.mxu0 %v2206_v60  ;;  %957 = vmatprep.subr.bf16.mxu1 %v2211_v57  ;;  %2600 = vst [vmem:[#allocation60_spill] sm:$0xff] %v2230_v59  ;;  %2601 = vst [vmem:[#allocation61_spill] sm:$0xff] %v2235_v49  ;;  %v2242_v60 = vld [vmem:[%s2466_s2 + $0x380] ss:$16 sps:$4 sm:$0xff]   ;;  %v2247_v57 = vld [vmem:[%s2466_s2 + $0x388] ss:$16 sps:$4 sm:$0xff]  }
  0x6d   :  { %2602 = vst [vmem:[#allocation62_spill] sm:$0xff] %v2242_v60  ;;  %2603 = vst [vmem:[#allocation63_spill] sm:$0xff] %v2247_v57 }
  0x6f   :  { %876 = vmatpush1.bf16.msra.mxu0 %v2218_v53  ;;  %958 = vmatpush1.bf16.msra.mxu1 %v2223_v63  ;;  %v2254_v53 = vld [vmem:[%s2466_s2 + $0x3a4] ss:$16 sps:$4 sm:$0xff]   ;;  %v2259_v63 = vld [vmem:[%s2466_s2 + $0x3ac] ss:$16 sps:$4 sm:$0xff]  }
  0x70   :  { %877 = vmatprep.subr.bf16.mxu0 %v2230_v59  ;;  %959 = vmatprep.subr.bf16.mxu1 %v2235_v49  ;;  %2604 = vst [vmem:[#allocation64_spill] sm:$0xff] %v2254_v53  ;;  %2605 = vst [vmem:[#allocation65_spill] sm:$0xff] %v2259_v63  ;;  %v2266_v59 = vld [vmem:[%s2466_s2 + $0x3a0] ss:$16 sps:$4 sm:$0xff]   ;;  %v2271_v49 = vld [vmem:[%s2466_s2 + $0x3a8] ss:$16 sps:$4 sm:$0xff]  }
  0x71   :  { %2606 = vst [vmem:[#allocation66_spill] sm:$0xff] %v2266_v59  ;;  %2607 = vst [vmem:[#allocation67_spill] sm:$0xff] %v2271_v49 }
  0x73   :  { %878 = vmatpush1.bf16.msra.mxu0 %v2242_v60  ;;  %960 = vmatpush1.bf16.msra.mxu1 %v2247_v57  ;;  %v2278_v60 = vld [vmem:[%s2466_s2 + $0x3c4] ss:$16 sps:$4 sm:$0xff]   ;;  %v2283_v57 = vld [vmem:[%s2466_s2 + $0x3cc] ss:$16 sps:$4 sm:$0xff]  }
  0x74   :  { %879 = vmatprep.subr.bf16.mxu0 %v2254_v53  ;;  %961 = vmatprep.subr.bf16.mxu1 %v2259_v63  ;;  %2608 = vst [vmem:[#allocation68_spill] sm:$0xff] %v2278_v60  ;;  %2609 = vst [vmem:[#allocation69_spill] sm:$0xff] %v2283_v57  ;;  %v2290_v53 = vld [vmem:[%s2466_s2 + $0x3c0] ss:$16 sps:$4 sm:$0xff]   ;;  %v2295_v63 = vld [vmem:[%s2466_s2 + $0x3c8] ss:$16 sps:$4 sm:$0xff]  }
  0x75   :  { %2610 = vst [vmem:[#allocation70_spill] sm:$0xff] %v2290_v53  ;;  %2611 = vst [vmem:[#allocation71_spill] sm:$0xff] %v2295_v63 }
  0x77   :  { %880 = vmatpush1.bf16.msra.mxu0 %v2266_v59  ;;  %962 = vmatpush1.bf16.msra.mxu1 %v2271_v49  ;;  %v2302_v59 = vld [vmem:[%s2466_s2 + $0x3e4] ss:$16 sps:$4 sm:$0xff]   ;;  %v2307_v49 = vld [vmem:[%s2466_s2 + $0x3ec] ss:$16 sps:$4 sm:$0xff]  }
  0x78   :  { %881 = vmatprep.subr.bf16.mxu0 %v2278_v60  ;;  %963 = vmatprep.subr.bf16.mxu1 %v2283_v57  ;;  %v2314_v60 = vld [vmem:[%s2466_s2 + $0x3e0] ss:$16 sps:$4 sm:$0xff]   ;;  %v2319_v57 = vld [vmem:[%s2466_s2 + $0x3e8] ss:$16 sps:$4 sm:$0xff]  }
  0x7b   :  { %882 = vmatpush1.bf16.msra.mxu0 %v2290_v53  ;;  %964 = vmatpush1.bf16.msra.mxu1 %v2295_v63  ;;  %v170_v63 = vpack.c.bf16 %v1835_v54, %v1835_v54  ;;  %v159_v53 = vpack.c.bf16 %v154_v58, %v154_v58  ;;  %v2659_v54 = vld [vmem:[#allocation49_spill] sm:$0xff]  ;;  %v2661_v58 = vld [vmem:[#allocation51_spill] sm:$0xff] }
  0x7c   :  { %883 = vmatprep.subr.bf16.mxu0 %v2302_v59  ;;  %965 = vmatprep.subr.bf16.mxu1 %v2307_v49 }
  0x7f   :  { %884 = vmatpush1.bf16.msra.mxu0 %v2314_v60  ;;  %966 = vmatpush1.bf16.msra.mxu1 %v2319_v57 }
  0x80   :  { %980 = vmatprep.subr.bf16.mxu0 %v1531_v0  ;;  %1062 = vmatprep.subr.bf16.mxu1 %v1536_v1  ;;  %v2612_v0 = vld [vmem:[#allocation3_spill] sm:$0xff]  ;;  %v2613_v1 = vld [vmem:[#allocation4_spill] sm:$0xff] }
  0x82   :  { %886 = vmatmul.mubr.bf16.vlgmr.msra.gmra.mrb[0].mxu0 %v170_v63  ;;  %968 = vmatmul.mubr.bf16.vlgmr.msra.gmra.mrb[0].mxu1 %v170_v63  ;;  %v2664_v63 = vld [vmem:[#allocation54_spill] sm:$0xff] }
  0x83   :  { %981 = vmatpush1.bf16.msra.mxu0 %v1542_v2  ;;  %1063 = vmatpush1.bf16.msra.mxu1 %v1547_v3  ;;  %v2614_v2 = vld [vmem:[#allocation5_spill] sm:$0xff]  ;;  %v2615_v3 = vld [vmem:[#allocation6_spill] sm:$0xff] }
  0x84   :  { %982 = vmatprep.subr.bf16.mxu0 %v1553_v4  ;;  %1064 = vmatprep.subr.bf16.mxu1 %v1560_v5  ;;  %v2616_v4 = vld [vmem:[#allocation7_spill] sm:$0xff]  ;;  %v2617_v5 = vld [vmem:[#allocation8_spill] sm:$0xff] }
  0x85   :  { %1012 = vmatprep.mubr.bf16.mxu0 %v159_v53  ;;  %1094 = vmatprep.mubr.bf16.mxu1 %v159_v53  ;;  %v2668_v53 = vld [vmem:[#allocation58_spill] sm:$0xff] }
  0x87   :  { %983 = vmatpush1.bf16.msra.mxu0 %v1565_v6  ;;  %1065 = vmatpush1.bf16.msra.mxu1 %v1571_v7  ;;  %v2618_v6 = vld [vmem:[#allocation9_spill] sm:$0xff]  ;;  %v2619_v7 = vld [vmem:[#allocation10_spill] sm:$0xff] }
  0x88   :  { %984 = vmatprep.subr.bf16.mxu0 %v1577_v8  ;;  %1066 = vmatprep.subr.bf16.mxu1 %v1582_v9  ;;  %v2620_v8 = vld [vmem:[#allocation11_spill] sm:$0xff]  ;;  %v2621_v9 = vld [vmem:[#allocation12_spill] sm:$0xff] }
  0x8b   :  { %985 = vmatpush1.bf16.msra.mxu0 %v1587_v10  ;;  %1067 = vmatpush1.bf16.msra.mxu1 %v1592_v11  ;;  %v2622_v10 = vld [vmem:[#allocation13_spill] sm:$0xff]  ;;  %v2623_v11 = vld [vmem:[#allocation14_spill] sm:$0xff] }
  0x8c   :  { %986 = vmatprep.subr.bf16.mxu0 %v1599_v12  ;;  %1068 = vmatprep.subr.bf16.mxu1 %v1606_v13  ;;  %v2624_v12 = vld [vmem:[#allocation2_spill] sm:$0xff] }
  0x8d   :  { %v155_v13 = vcombine.high %v2624_v12, %v2624_v12 }
  0x8f   :  { %987 = vmatpush1.bf16.msra.mxu0 %v1611_v14  ;;  %1069 = vmatpush1.bf16.msra.mxu1 %v1618_v15  ;;  %v158_v14 = vpack.c.bf16 %v1813_v48, %v1813_v48  ;;  %v2625_v15 = vld [vmem:[#allocation15_spill] sm:$0xff] }
  0x90   :  { %988 = vmatprep.subr.bf16.mxu0 %v1623_v16  ;;  %1070 = vmatprep.subr.bf16.mxu1 %v1630_v17  ;;  %v161_v16 = vpack.c.bf16 %v155_v13, %v155_v13  ;;  %v2626_v17 = vld [vmem:[#allocation16_spill] sm:$0xff]  ;;  %v2657_v48 = vld [vmem:[#allocation47_spill] sm:$0xff] }
  0x91   :  { %v2681_v13 = vld [vmem:[#allocation71_spill] sm:$0xff] }
  0x93   :  { %989 = vmatpush1.bf16.msra.mxu0 %v1635_v18  ;;  %1071 = vmatpush1.bf16.msra.mxu1 %v1640_v19  ;;  %v2627_v18 = vld [vmem:[#allocation17_spill] sm:$0xff]  ;;  %v2628_v19 = vld [vmem:[#allocation18_spill] sm:$0xff] }
  0x94   :  { %990 = vmatprep.subr.bf16.mxu0 %v1647_v20  ;;  %1072 = vmatprep.subr.bf16.mxu1 %v1654_v21  ;;  %v2629_v20 = vld [vmem:[#allocation19_spill] sm:$0xff]  ;;  %v2630_v21 = vld [vmem:[#allocation20_spill] sm:$0xff] }
  0x97   :  { %991 = vmatpush1.bf16.msra.mxu0 %v1659_v22  ;;  %1073 = vmatpush1.bf16.msra.mxu1 %v1666_v23  ;;  %v2631_v22 = vld [vmem:[#allocation21_spill] sm:$0xff]  ;;  %v2632_v23 = vld [vmem:[#allocation22_spill] sm:$0xff] }
  0x98   :  { %992 = vmatprep.subr.bf16.mxu0 %v1671_v24  ;;  %1074 = vmatprep.subr.bf16.mxu1 %v1678_v25  ;;  %v2633_v24 = vld [vmem:[#allocation23_spill] sm:$0xff]  ;;  %v2634_v25 = vld [vmem:[#allocation24_spill] sm:$0xff] }
  0x9b   :  { %993 = vmatpush1.bf16.msra.mxu0 %v1683_v26  ;;  %1075 = vmatpush1.bf16.msra.mxu1 %v1688_v27  ;;  %v2635_v26 = vld [vmem:[#allocation25_spill] sm:$0xff]  ;;  %v2636_v27 = vld [vmem:[#allocation26_spill] sm:$0xff] }
  0x9c   :  { %994 = vmatprep.subr.bf16.mxu0 %v1695_v28  ;;  %1076 = vmatprep.subr.bf16.mxu1 %v1702_v29  ;;  %v2637_v28 = vld [vmem:[#allocation27_spill] sm:$0xff]  ;;  %v2638_v29 = vld [vmem:[#allocation28_spill] sm:$0xff] }
  0x9f   :  { %995 = vmatpush1.bf16.msra.mxu0 %v1707_v30  ;;  %1077 = vmatpush1.bf16.msra.mxu1 %v1714_v31  ;;  %v2639_v30 = vld [vmem:[#allocation29_spill] sm:$0xff]  ;;  %v2640_v31 = vld [vmem:[#allocation30_spill] sm:$0xff] }
  0xa0   :  { %996 = vmatprep.subr.bf16.mxu0 %v1719_v32  ;;  %1078 = vmatprep.subr.bf16.mxu1 %v1726_v33  ;;  %v2641_v32 = vld [vmem:[#allocation31_spill] sm:$0xff]  ;;  %v2642_v33 = vld [vmem:[#allocation32_spill] sm:$0xff] }
  0xa3   :  { %997 = vmatpush1.bf16.msra.mxu0 %v1731_v34  ;;  %1079 = vmatpush1.bf16.msra.mxu1 %v1736_v35  ;;  %v2643_v34 = vld [vmem:[#allocation33_spill] sm:$0xff]  ;;  %v2644_v35 = vld [vmem:[#allocation34_spill] sm:$0xff] }
  0xa4   :  { %998 = vmatprep.subr.bf16.mxu0 %v1743_v36  ;;  %1080 = vmatprep.subr.bf16.mxu1 %v1750_v37  ;;  %v2645_v36 = vld [vmem:[#allocation35_spill] sm:$0xff]  ;;  %v2646_v37 = vld [vmem:[#allocation36_spill] sm:$0xff] }
  0xa7   :  { %999 = vmatpush1.bf16.msra.mxu0 %v1755_v38  ;;  %1081 = vmatpush1.bf16.msra.mxu1 %v1762_v39  ;;  %v2647_v38 = vld [vmem:[#allocation37_spill] sm:$0xff]  ;;  %v2648_v39 = vld [vmem:[#allocation38_spill] sm:$0xff] }
  0xa8   :  { %1000 = vmatprep.subr.bf16.mxu0 %v1767_v40  ;;  %1082 = vmatprep.subr.bf16.mxu1 %v1774_v41  ;;  %v2649_v40 = vld [vmem:[#allocation39_spill] sm:$0xff]  ;;  %v2650_v41 = vld [vmem:[#allocation40_spill] sm:$0xff] }
  0xab   :  { %1001 = vmatpush1.bf16.msra.mxu0 %v1779_v42  ;;  %1083 = vmatpush1.bf16.msra.mxu1 %v1784_v43  ;;  %v2651_v42 = vld [vmem:[#allocation41_spill] sm:$0xff]  ;;  %v2652_v43 = vld [vmem:[#allocation42_spill] sm:$0xff] }
  0xac   :  { %1002 = vmatprep.subr.bf16.mxu0 %v1791_v44  ;;  %1084 = vmatprep.subr.bf16.mxu1 %v1798_v45  ;;  %v2653_v44 = vld [vmem:[#allocation43_spill] sm:$0xff]  ;;  %v2654_v45 = vld [vmem:[#allocation44_spill] sm:$0xff] }
  0xaf   :  { %1003 = vmatpush1.bf16.msra.mxu0 %v1803_v46  ;;  %1085 = vmatpush1.bf16.msra.mxu1 %v1808_v47  ;;  %v2655_v46 = vld [vmem:[#allocation45_spill] sm:$0xff]  ;;  %v2656_v47 = vld [vmem:[#allocation46_spill] sm:$0xff] }
  0xb0   :  { %1004 = vmatprep.subr.bf16.mxu0 %v1831_v52  ;;  %1086 = vmatprep.subr.bf16.mxu1 %v1842_v55  ;;  %v2658_v52 = vld [vmem:[#allocation48_spill] sm:$0xff]  ;;  %v2660_v55 = vld [vmem:[#allocation50_spill] sm:$0xff] }
  0xb3   :  { %1005 = vmatpush1.bf16.msra.mxu0 %v2612_v0  ;;  %1087 = vmatpush1.bf16.msra.mxu1 %v2613_v1  ;;  %v2669_v0 = vld [vmem:[#allocation59_spill] sm:$0xff]  ;;  %v2670_v1 = vld [vmem:[#allocation60_spill] sm:$0xff] }
  0xb4   :  { %1006 = vmatprep.subr.bf16.mxu0 %v2614_v2  ;;  %1088 = vmatprep.subr.bf16.mxu1 %v2615_v3  ;;  %v2671_v2 = vld [vmem:[#allocation61_spill] sm:$0xff]  ;;  %v2672_v3 = vld [vmem:[#allocation62_spill] sm:$0xff] }
  0xb7   :  { %1007 = vmatpush1.bf16.msra.mxu0 %v2616_v4  ;;  %1089 = vmatpush1.bf16.msra.mxu1 %v2617_v5  ;;  %v2673_v4 = vld [vmem:[#allocation63_spill] sm:$0xff]  ;;  %v2674_v5 = vld [vmem:[#allocation64_spill] sm:$0xff] }
  0xb8   :  { %1008 = vmatprep.subr.bf16.mxu0 %v2618_v6  ;;  %1090 = vmatprep.subr.bf16.mxu1 %v2619_v7  ;;  %v2675_v6 = vld [vmem:[#allocation65_spill] sm:$0xff]  ;;  %v2676_v7 = vld [vmem:[#allocation66_spill] sm:$0xff] }
  0xbb   :  { %1009 = vmatpush1.bf16.msra.mxu0 %v2620_v8  ;;  %1091 = vmatpush1.bf16.msra.mxu1 %v2621_v9  ;;  %v2677_v8 = vld [vmem:[#allocation67_spill] sm:$0xff]  ;;  %v2678_v9 = vld [vmem:[#allocation68_spill] sm:$0xff] }
  0xbc   :  { %1010 = vmatprep.subr.bf16.mxu0 %v2622_v10  ;;  %1092 = vmatprep.subr.bf16.mxu1 %v2623_v11  ;;  %v2679_v10 = vld [vmem:[#allocation69_spill] sm:$0xff]  ;;  %v2680_v11 = vld [vmem:[#allocation70_spill] sm:$0xff] }
  0xbf   :  { %1011 = vmatpush1.bf16.msra.mxu0 %v1926_v62  ;;  %1093 = vmatpush1.bf16.msra.mxu1 %v2625_v15  ;;  %v2663_v62 = vld [vmem:[#allocation53_spill] sm:$0xff] }
  0xc0   :  { %1021 = vmatprep.subr.bf16.mxu0 %v1938_v51  ;;  %1103 = vmatprep.subr.bf16.mxu1 %v1945_v50  ;;  %v2665_v50 = vld [vmem:[#allocation55_spill] sm:$0xff]  ;;  %v2666_v51 = vld [vmem:[#allocation56_spill] sm:$0xff] }
  0xc2   :  { %1013 = vmatmul.mubr.bf16.vlgmr.msra.gmra.mrb[4].mxu0 %v158_v14  ;;  %1095 = vmatmul.mubr.bf16.vlgmr.msra.gmra.mrb[4].mxu1 %v158_v14  ;;  %v160_v14 = vpack.c.bf16 %v2624_v12, %v2624_v12 }
  0xc3   :  { %1022 = vmatpush1.bf16.msra.mxu0 %v2626_v17  ;;  %1104 = vmatpush1.bf16.msra.mxu1 %v2627_v18 }
  0xc4   :  { %1023 = vmatprep.subr.bf16.mxu0 %v1964_v61  ;;  %1105 = vmatprep.subr.bf16.mxu1 %v2628_v19  ;;  %v2662_v61 = vld [vmem:[#allocation52_spill] sm:$0xff] }
  0xc5   :  { %1053 = vmatprep.mubr.bf16.mxu0 %v161_v16  ;;  %1135 = vmatprep.mubr.bf16.mxu1 %v161_v16 }
  0xc7   :  { %1024 = vmatpush1.bf16.msra.mxu0 %v2629_v20  ;;  %1106 = vmatpush1.bf16.msra.mxu1 %v2630_v21 }
  0xc8   :  { %1025 = vmatprep.subr.bf16.mxu0 %v2631_v22  ;;  %1107 = vmatprep.subr.bf16.mxu1 %v2632_v23 }
  0xcb   :  { %1026 = vmatpush1.bf16.msra.mxu0 %v2633_v24  ;;  %1108 = vmatpush1.bf16.msra.mxu1 %v2634_v25 }
  0xcc   :  { %1027 = vmatprep.subr.bf16.mxu0 %v2635_v26  ;;  %1109 = vmatprep.subr.bf16.mxu1 %v2636_v27 }
  0xcf   :  { %1028 = vmatpush1.bf16.msra.mxu0 %v2637_v28  ;;  %1110 = vmatpush1.bf16.msra.mxu1 %v2638_v29 }
  0xd0   :  { %1029 = vmatprep.subr.bf16.mxu0 %v2639_v30  ;;  %1111 = vmatprep.subr.bf16.mxu1 %v2640_v31 }
  0xd3   :  { %1030 = vmatpush1.bf16.msra.mxu0 %v2048_v56  ;;  %1112 = vmatpush1.bf16.msra.mxu1 %v2641_v32  ;;  %v2667_v56 = vld [vmem:[#allocation57_spill] sm:$0xff] }
  0xd4   :  { %1031 = vmatprep.subr.bf16.mxu0 %v2642_v33  ;;  %1113 = vmatprep.subr.bf16.mxu1 %v2643_v34 }
  0xd7   :  { %1032 = vmatpush1.bf16.msra.mxu0 %v2644_v35  ;;  %1114 = vmatpush1.bf16.msra.mxu1 %v2645_v36 }
  0xd8   :  { %1033 = vmatprep.subr.bf16.mxu0 %v2646_v37  ;;  %1115 = vmatprep.subr.bf16.mxu1 %v2647_v38 }
  0xdb   :  { %1034 = vmatpush1.bf16.msra.mxu0 %v2648_v39  ;;  %1116 = vmatpush1.bf16.msra.mxu1 %v2649_v40 }
  0xdc   :  { %1035 = vmatprep.subr.bf16.mxu0 %v2650_v41  ;;  %1117 = vmatprep.subr.bf16.mxu1 %v2651_v42 }
  0xdf   :  { %1036 = vmatpush1.bf16.msra.mxu0 %v2652_v43  ;;  %1118 = vmatpush1.bf16.msra.mxu1 %v2653_v44 }
  0xe0   :  { %1037 = vmatprep.subr.bf16.mxu0 %v2654_v45  ;;  %1119 = vmatprep.subr.bf16.mxu1 %v2655_v46 }
  0xe3   :  { %1038 = vmatpush1.bf16.msra.mxu0 %v2656_v47  ;;  %1120 = vmatpush1.bf16.msra.mxu1 %v2657_v48 }
  0xe4   :  { %1039 = vmatprep.subr.bf16.mxu0 %v2658_v52  ;;  %1121 = vmatprep.subr.bf16.mxu1 %v2659_v54 }
  0xe7   :  { %1040 = vmatpush1.bf16.msra.mxu0 %v2660_v55  ;;  %1122 = vmatpush1.bf16.msra.mxu1 %v2661_v58 }
  0xe8   :  { %1041 = vmatprep.subr.bf16.mxu0 %v2662_v61  ;;  %1123 = vmatprep.subr.bf16.mxu1 %v2663_v62 }
  0xeb   :  { %1042 = vmatpush1.bf16.msra.mxu0 %v2664_v63  ;;  %1124 = vmatpush1.bf16.msra.mxu1 %v2665_v50 }
  0xec   :  { %1043 = vmatprep.subr.bf16.mxu0 %v2666_v51  ;;  %1125 = vmatprep.subr.bf16.mxu1 %v2667_v56 }
  0xef   :  { %1044 = vmatpush1.bf16.msra.mxu0 %v2668_v53  ;;  %1126 = vmatpush1.bf16.msra.mxu1 %v2669_v0 }
  0xf0   :  { %1045 = vmatprep.subr.bf16.mxu0 %v2670_v1  ;;  %1127 = vmatprep.subr.bf16.mxu1 %v2671_v2 }
  0xf3   :  { %1046 = vmatpush1.bf16.msra.mxu0 %v2672_v3  ;;  %1128 = vmatpush1.bf16.msra.mxu1 %v2673_v4 }
  0xf4   :  { %1047 = vmatprep.subr.bf16.mxu0 %v2674_v5  ;;  %1129 = vmatprep.subr.bf16.mxu1 %v2675_v6 }
  0xf7   :  { %1048 = vmatpush1.bf16.msra.mxu0 %v2676_v7  ;;  %1130 = vmatpush1.bf16.msra.mxu1 %v2677_v8 }
  0xf8   :  { %1049 = vmatprep.subr.bf16.mxu0 %v2678_v9  ;;  %1131 = vmatprep.subr.bf16.mxu1 %v2679_v10 }
  0xfb   :  { %1050 = vmatpush1.bf16.msra.mxu0 %v2680_v11  ;;  %1132 = vmatpush1.bf16.msra.mxu1 %v2681_v13 }
  0xfc   :  { %1051 = vmatprep.subr.bf16.mxu0 %v2302_v59  ;;  %1133 = vmatprep.subr.bf16.mxu1 %v2307_v49 }
  0xff   :  { %1052 = vmatpush1.bf16.msra.mxu0 %v2314_v60  ;;  %1134 = vmatpush1.bf16.msra.mxu1 %v2319_v57 }
 0x102   :  { %1054 = vmatmul.mubr.bf16.vlgmr.msra.gmra.mrb[4].mxu0 %v160_v14  ;;  %1136 = vmatmul.mubr.bf16.vlgmr.msra.gmra.mrb[4].mxu1 %v160_v14 }
 0x155   :  { %v887_v15 = vpop.f32.mrb[0].mxu0  ;;  %v969_v16 = vpop.f32.mrb[0].mxu1 }
 0x156   :  { %v889_v17 = vpop.f32.mrb[1].mxu0  ;;  %v971_v18 = vpop.f32.mrb[1].mxu1  ;;  %v976_v24 = vmul.f32 1000.0, %v887_v15  ;;  %v978_v25 = vmul.f32 1000.0, %v969_v16 }
 0x157   :  { %v1144_v19 = vmax.f32 %v887_v15, %v889_v17  ;;  %v891_v20 = vpop.f32.mrb[2].mxu0  ;;  %v973_v21 = vpop.f32.mrb[2].mxu1  ;;  %v977_v12 = vmul.f32 1000.0, %v889_v17  ;;  %v979_v26 = vmul.f32 1000.0, %v971_v18 }
 0x158   :  { %v892_v22 = vpop.f32.mrb[3].mxu0  ;;  %v974_v59 = vpop.f32.mrb[3].mxu1 }
 0x159   :  { %v1145_v23 = vmax.f32 %v1144_v19, %v969_v16 }
 0x15b   :  { %v1146_v49 = vmax.f32 %v1145_v23, %v971_v18 }
 0x15d   :  { %v1150_v39 = vmul.f32 1000.0, %v1146_v49 }
 0x1d5   :  { %v1055_v60 = vpop.f32.mrb[4].mxu0  ;;  %v1137_v27 = vpop.f32.mrb[4].mxu1 }
 0x1d6   :  { %v1289_v57 = vadd.f32 %v1055_v60, %v976_v24  ;;  %v1291_v28 = vadd.f32 %v1137_v27, %v978_v25  ;;  %v1057_v29 = vpop.f32.mrb[5].mxu0  ;;  %v1139_v30 = vpop.f32.mrb[5].mxu1 }
 0x1d7   :  { %v1290_v31 = vadd.f32 %v1057_v29, %v977_v12  ;;  %v1292_v32 = vadd.f32 %v1139_v30, %v979_v26  ;;  %v1059_v33 = vpop.f32.mrb[6].mxu0  ;;  %v1141_v34 = vpop.f32.mrb[6].mxu1 }
 0x1d8   :  { %v1060_v35 = vpop.f32.mrb[7].mxu0  ;;  %v1142_v36 = vpop.f32.mrb[7].mxu1 }
 0x1d9   :  { %v1147_v37 = vmax.f32 %v1289_v57, %v1290_v31 }
 0x1db   :  { %v1148_v38 = vmax.f32 %v1147_v37, %v1291_v28 }
 0x1dd   :  { %v1149_v40 = vmax.f32 %v1148_v38, %v1292_v32 }
 0x1df   :  { %v1151_v41 = vsub.f32 %v1149_v40, %v1150_v39 }
 0x1e1   :  { %1152 = vst [vmem:[%s2470_s4] sm:$0xf] %v1151_v41 }

</bundles_post_ra>
